<compile_context>
chip_gen: v7x
topology: tpu7x:2x2x1
jax: 0.10.0
libtpu: 0.0.40
codegen_flags: <defaults>
</compile_context>

<pallas_src>
import math

import numpy as np

import jax
import jax.numpy as jnp
from jax import lax
from jax.experimental import pallas as pl
from jax.experimental.pallas import tpu as pltpu


def downmix_kernel(ph_ref, halo_ref, w_ref, b_ref, alpha_ref, xd_ref, o_ref):
    C = ph_ref.shape[2]
    TM = ph_ref.shape[3]
    Wo = halo_ref.shape[4]
    CD = w_ref.shape[1]

    # Stride-2 phase planes of the input tile, flattened to (C, TM = TR*Wo).
    p_ee = ph_ref[0, 0]        # even rows, even cols -> tap (ki=1, kj=1)
    p_eo = ph_ref[0, 1]        # even rows, odd  cols -> taps (1, 0/2)
    p_oe = ph_ref[0, 2]        # odd  rows, even cols -> taps (0/2, 1)
    p_oo = ph_ref[0, 3]        # odd  rows, odd  cols -> taps (0/2, 0/2)
    h_oe = halo_ref[0, 0, 0]   # (C, Wo) odd row just above the tile (reflect for tile 0)
    h_oo = halo_ref[0, 0, 1]

    # ki=0 taps use the odd row ABOVE each output row: shift rows down by one,
    # feeding the halo row into row 0 (this also realizes the top reflect pad).
    if TM > Wo:
        u_oe = jnp.concatenate([h_oe, p_oe[:, : TM - Wo]], axis=1)
        u_oo = jnp.concatenate([h_oo, p_oo[:, : TM - Wo]], axis=1)
    else:
        u_oe, u_oo = h_oe, h_oo

    # kj=0 taps use the odd column to the LEFT: shift cols right by one within
    # each row; column 0 replicates (left reflect pad maps col -1 -> col 1).
    first_col = lax.broadcasted_iota(jnp.int32, (1, TM), 1) % Wo == 0

    def shift_cols(a):
        s = jnp.concatenate([a[:, :1], a[:, : TM - 1]], axis=1)
        return jnp.where(first_col, a, s)

    slabs = (shift_cols(u_oo), u_oe, u_oo,      # (ki=0, kj=0/1/2)
             shift_cols(p_eo), p_ee, p_eo,      # (ki=1, kj=0/1/2)
             shift_cols(p_oo), p_oe, p_oo)      # (ki=2, kj=0/1/2)

    # 9 accumulating MXU matmuls with f32 accumulation (MXU is <2% utilized
    # anyway -- the kernel is HBM bound, so no point building a K=36 stack).
    acc = jnp.zeros((CD, TM), jnp.float32)
    for k, s in enumerate(slabs):
        acc += jnp.dot(w_ref[k], s, preferred_element_type=jnp.float32)

    # f32 epilogue: (beta-folded) bias + residual + per-channel PReLU.
    y = acc + b_ref[...] + xd_ref[0].astype(jnp.float32)
    o_ref[0] = jnp.where(y > 0.0, y, alpha_ref[...] * y).astype(o_ref.dtype)


def _pick_tr(Ho, Wo, target_tm):
    """Rows per tile so the flat tile TM = tr*Wo is lane-dense and legal
    (TM % 128 == 0 or TM == Ho*Wo), preferring multiples of 512 near target."""
    M = Ho * Wo
    if M <= max(target_tm, 256):
        return Ho
    trs = []
    for align in (512, 128):
        step = align // math.gcd(Wo, align)
        tr = min(max((target_tm // Wo) // step * step, step), Ho)
        trs.append(tr)
    tr512, tr128 = trs
    return tr512 if tr512 * Wo <= 2 * target_tm else tr128


def downmix_forward(x, x_deep, t, w, b, beta, alpha, *, target_tm=16384,
                    compute_dtype=jnp.bfloat16):
    """x: (N,c,H,W), x_deep: (N,cd,H//2,W//2) NCHW.  Returns NCHW output.

    target_tm: flattened spatial tile size; 8-16K for v5e/v6e, ~32K on v7x.
    """
    del t  # unused by the module's forward
    N, C, H, W = x.shape
    CD = w.shape[0]
    assert H % 2 == 0 and W % 2 == 0, "even H, W assumed (2x downsample)"
    # TODO(synk): odd H/W would also need bottom/right reflect rows/cols.
    Ho, Wo = H // 2, W // 2
    M = Ho * Wo

    # ---- host: one space-to-depth + bf16 cast pass (replaces the 2.25x im2col).
    xb = x.astype(compute_dtype)
    p_ee = xb[:, :, 0::2, 0::2]
    p_eo = xb[:, :, 0::2, 1::2]
    p_oe = xb[:, :, 1::2, 0::2]
    p_oo = xb[:, :, 1::2, 1::2]
    phases = jnp.stack([p_ee, p_eo, p_oe, p_oo], axis=1).reshape(N, 4, C, M)

    # ---- tiling: big lane-dense tiles, cdiv grid, no host pad / output slice.
    tr = _pick_tr(Ho, Wo, target_tm)
    n_tiles = -(-Ho // tr)
    if N * n_tiles < 2 and M > 4096:
        # Keep both v7x TensorCores busy when the batch is 1.
        tr_half = _pick_tr(Ho, Wo, (M + 1) // 2)
        if tr_half < Ho:
            tr, n_tiles = tr_half, -(-Ho // tr_half)
    tm = tr * Wo

    # ---- tiny per-tile row halo: the odd input row just above each tile
    # (tile 0 gets input row 1, i.e. the top reflect pad).
    halo_rows = np.maximum(np.arange(n_tiles) * tr - 1, 0)
    halo = jnp.stack([p_oe[:, :, halo_rows, :], p_oo[:, :, halo_rows, :]], axis=1)
    halo = jnp.transpose(halo, (0, 3, 1, 2, 4))          # (N, n_tiles, 2, C, Wo)

    # ---- fold beta into the conv weight / bias; arrange weights per tap.
    beta_vec = beta.reshape(CD).astype(jnp.float32)
    w_f = w.astype(jnp.float32) * beta_vec[:, None, None, None]        # (CD,C,3,3)
    w_taps = jnp.transpose(w_f, (2, 3, 0, 1)).reshape(9, CD, C).astype(compute_dtype)
    b_col = (b.astype(jnp.float32) * beta_vec).reshape(CD, 1)
    alpha_col = alpha.astype(jnp.float32).reshape(CD, 1)

    # Residual streamed in compute_dtype (in a full model this cast fuses into
    # the layer producing x_deep); epilogue math stays f32.
    xd_flat = x_deep.reshape(N, CD, M).astype(compute_dtype)

    out_flat = pl.pallas_call(
        downmix_kernel,
        out_shape=jax.ShapeDtypeStruct((N, CD, M), x.dtype),
        grid_spec=pltpu.PrefetchScalarGridSpec(
            num_scalar_prefetch=0,
            grid=(N, n_tiles),
            in_specs=[
                pl.BlockSpec((1, 4, C, tm), lambda n, r: (n, 0, 0, r)),        # phases
                pl.BlockSpec((1, 1, 2, C, Wo), lambda n, r: (n, r, 0, 0, 0)),  # row halo
                pl.BlockSpec((9, CD, C), lambda n, r: (0, 0, 0)),              # beta-folded weights
                pl.BlockSpec((CD, 1), lambda n, r: (0, 0)),                    # beta-folded bias
                pl.BlockSpec((CD, 1), lambda n, r: (0, 0)),                    # PReLU alpha
                pl.BlockSpec((1, CD, tm), lambda n, r: (n, 0, r)),             # x_deep tile
            ],
            out_specs=pl.BlockSpec((1, CD, tm), lambda n, r: (n, 0, r)),
        ),
        compiler_params=pltpu.CompilerParams(
            dimension_semantics=("parallel", "parallel")),
    )(phases, halo, w_taps, b_col, alpha_col, xd_flat)

    # (N, CD, M) -> (N, CD, Ho, Wo): contiguous reshape, no copy, no slice.
    return out_flat.reshape(N, CD, Ho, Wo)


def _reference(x, x_deep, w, b, beta, alpha):
    # Pure-JAX reference of the PyTorch forward (NCHW conv on reflect-padded x).
    xp = jnp.pad(x, ((0, 0), (0, 0), (1, 1), (1, 1)), mode="reflect")
    y = lax.conv_general_dilated(
        xp, w, window_strides=(2, 2), padding="VALID",
        dimension_numbers=("NCHW", "OIHW", "NCHW"))
    y = (y + b.reshape(1, -1, 1, 1)) * beta + x_deep
    a = alpha.reshape(1, -1, 1, 1)
    return jnp.where(y > 0, y, a * y)


if __name__ == "__main__":
    key = jax.random.PRNGKey(0)
    N, C, CD, H, W = 2, 4, 8, 16, 16
    Ho, Wo = H // 2, W // 2

    k1, k2, k3, k4 = jax.random.split(key, 4)
    x = jax.random.normal(k1, (N, C, H, W), dtype=jnp.float32)
    x_deep = jax.random.normal(k2, (N, CD, Ho, Wo), dtype=jnp.float32)
    t = jax.random.normal(k3, (N, 1), dtype=jnp.float32)  # unused by forward

    # Deterministic synthetic parameters (module shapes; beta/alpha perturbed
    # away from their init values so the beta-fold / per-channel PReLU paths
    # are actually exercised by the check).
    w = 0.1 * jax.random.normal(k4, (CD, C, 3, 3), dtype=jnp.float32)   # Conv2d weight
    b = 0.01 * jnp.arange(CD, dtype=jnp.float32)                        # Conv2d bias
    beta = (1.0 + 0.05 * jnp.arange(CD, dtype=jnp.float32)).reshape(1, CD, 1, 1)
    alpha = 0.2 + 0.01 * jnp.arange(CD, dtype=jnp.float32)              # PReLU weights

    ref = _reference(x, x_deep, w, b, beta, alpha)

    # f32 compute path: tight numerical check of the kernel structure.
    out_f32 = jax.block_until_ready(
        downmix_forward(x, x_deep, t, w, b, beta, alpha, compute_dtype=jnp.float32))
    assert out_f32.shape == (N, CD, Ho, Wo)
    assert jnp.allclose(out_f32, ref, atol=1e-3, rtol=1e-3), "f32 mismatch vs reference"

    # Default bf16 streaming path: loose tolerance for bf16 operands.
    out_bf16 = jax.block_until_ready(
        downmix_forward(x, x_deep, t, w, b, beta, alpha, compute_dtype=jnp.bfloat16))
    assert out_bf16.shape == (N, CD, Ho, Wo)
    assert jnp.allclose(out_bf16, ref, atol=5e-2, rtol=5e-2), "bf16 mismatch vs reference"

    print("KERNEL_OK")
</pallas_src>

<mosaic_0001>
module attributes {stable_mosaic.version = 11 : i64} {
  func.func @downmix_kernel(%arg0: i32, %arg1: i32, %arg2: memref<1x4x4x64xf32, #tpu.memory_space<vmem>>, %arg3: memref<1x1x2x4x8xf32, #tpu.memory_space<vmem>>, %arg4: memref<9x8x4xf32, #tpu.memory_space<vmem>>, %arg5: memref<8x1xf32, #tpu.memory_space<vmem>>, %arg6: memref<8x1xf32, #tpu.memory_space<vmem>>, %arg7: memref<1x8x64xf32, #tpu.memory_space<vmem>>, %arg8: memref<1x8x64xf32, #tpu.memory_space<vmem>>) attributes {dimension_semantics = [#tpu.dimension_semantics<parallel>, #tpu.dimension_semantics<parallel>], iteration_bounds = array<i64: 2, 1>, scalar_prefetch = 0 : i64, scratch_operands = 0 : i64, tpu.core_type = #tpu.core_type<tc>, window_params = [{transform_indices = @transform_0, window_bounds = array<i64: 1, 4, 4, 64>}, {transform_indices = @transform_1, window_bounds = array<i64: 1, 1, 2, 4, 8>}, {pipeline_mode = #tpu.pipeline_mode<synchronous>, transform_indices = @transform_2, window_bounds = array<i64: 9, 8, 4>}, {pipeline_mode = #tpu.pipeline_mode<synchronous>, transform_indices = @transform_3, window_bounds = array<i64: 8, 1>}, {pipeline_mode = #tpu.pipeline_mode<synchronous>, transform_indices = @transform_4, window_bounds = array<i64: 8, 1>}, {transform_indices = @transform_5, window_bounds = array<i64: 1, 8, 64>}, {transform_indices = @transform_6, window_bounds = array<i64: 1, 8, 64>}]} {
    %c0 = arith.constant 0 : index
    %c0_0 = arith.constant 0 : index
    %c0_1 = arith.constant 0 : index
    %c0_2 = arith.constant 0 : index
    %0 = vector.load %arg2[%c0, %c0_0, %c0_1, %c0_2] : memref<1x4x4x64xf32, #tpu.memory_space<vmem>>, vector<1x1x4x64xf32>
    %1 = vector.shape_cast %0 : vector<1x1x4x64xf32> to vector<4x64xf32>
    %c0_3 = arith.constant 0 : index
    %c1 = arith.constant 1 : index
    %c0_4 = arith.constant 0 : index
    %c0_5 = arith.constant 0 : index
    %2 = vector.load %arg2[%c0_3, %c1, %c0_4, %c0_5] : memref<1x4x4x64xf32, #tpu.memory_space<vmem>>, vector<1x1x4x64xf32>
    %3 = vector.shape_cast %2 : vector<1x1x4x64xf32> to vector<4x64xf32>
    %c0_6 = arith.constant 0 : index
    %c2 = arith.constant 2 : index
    %c0_7 = arith.constant 0 : index
    %c0_8 = arith.constant 0 : index
    %4 = vector.load %arg2[%c0_6, %c2, %c0_7, %c0_8] : memref<1x4x4x64xf32, #tpu.memory_space<vmem>>, vector<1x1x4x64xf32>
    %5 = vector.shape_cast %4 : vector<1x1x4x64xf32> to vector<4x64xf32>
    %c0_9 = arith.constant 0 : index
    %c3 = arith.constant 3 : index
    %c0_10 = arith.constant 0 : index
    %c0_11 = arith.constant 0 : index
    %6 = vector.load %arg2[%c0_9, %c3, %c0_10, %c0_11] : memref<1x4x4x64xf32, #tpu.memory_space<vmem>>, vector<1x1x4x64xf32>
    %7 = vector.shape_cast %6 : vector<1x1x4x64xf32> to vector<4x64xf32>
    %c0_12 = arith.constant 0 : index
    %c0_13 = arith.constant 0 : index
    %c0_14 = arith.constant 0 : index
    %c0_15 = arith.constant 0 : index
    %c0_16 = arith.constant 0 : index
    %8 = vector.load %arg3[%c0_12, %c0_13, %c0_14, %c0_15, %c0_16] : memref<1x1x2x4x8xf32, #tpu.memory_space<vmem>>, vector<1x1x1x4x8xf32>
    %9 = vector.shape_cast %8 : vector<1x1x1x4x8xf32> to vector<4x8xf32>
    %c0_17 = arith.constant 0 : index
    %c0_18 = arith.constant 0 : index
    %c1_19 = arith.constant 1 : index
    %c0_20 = arith.constant 0 : index
    %c0_21 = arith.constant 0 : index
    %10 = vector.load %arg3[%c0_17, %c0_18, %c1_19, %c0_20, %c0_21] : memref<1x1x2x4x8xf32, #tpu.memory_space<vmem>>, vector<1x1x1x4x8xf32>
    %11 = vector.shape_cast %10 : vector<1x1x1x4x8xf32> to vector<4x8xf32>
    %12 = vector.extract_strided_slice %5 {offsets = [0, 0], sizes = [4, 56], strides = [1, 1]} : vector<4x64xf32> to vector<4x56xf32>
    %13 = tpu.concatenate %9, %12 in 1 : vector<4x8xf32>, vector<4x56xf32> -> vector<4x64xf32>
    %14 = vector.extract_strided_slice %7 {offsets = [0, 0], sizes = [4, 56], strides = [1, 1]} : vector<4x64xf32> to vector<4x56xf32>
    %15 = tpu.concatenate %11, %14 in 1 : vector<4x8xf32>, vector<4x56xf32> -> vector<4x64xf32>
    %16 = tpu.iota {dimensions = array<i32: 1>} : vector<1x64xi32>
    %c8_i32 = arith.constant 8 : i32
    %c0_i32 = arith.constant 0 : i32
    %17 = arith.cmpi eq, %c8_i32, %c0_i32 : i32
    %c1_i32 = arith.constant 1 : i32
    %18 = arith.select %17, %c1_i32, %c8_i32 : i32
    %19 = vector.broadcast %18 : i32 to vector<1x64xi32>
    %20 = arith.remsi %16, %19 : vector<1x64xi32>
    %c0_i32_22 = arith.constant 0 : i32
    %21 = vector.broadcast %c0_i32_22 : i32 to vector<1x64xi32>
    %22 = arith.cmpi ne, %20, %21 : vector<1x64xi32>
    %c0_i32_23 = arith.constant 0 : i32
    %23 = vector.broadcast %c0_i32_23 : i32 to vector<1x64xi32>
    %24 = arith.cmpi slt, %20, %23 : vector<1x64xi32>
    %c0_i32_24 = arith.constant 0 : i32
    %25 = arith.cmpi slt, %18, %c0_i32_24 : i32
    %26 = vector.broadcast %25 : i1 to vector<1x64xi1>
    %27 = vector.broadcast %26 : vector<1x64xi1> to vector<1x64xi1>
    %28 = arith.xori %24, %27 : vector<1x64xi1>
    %29 = arith.andi %28, %22 : vector<1x64xi1>
    %30 = vector.broadcast %18 : i32 to vector<1x64xi32>
    %31 = arith.addi %20, %30 : vector<1x64xi32>
    %32 = arith.select %29, %31, %20 : vector<1x64xi1>, vector<1x64xi32>
    %c0_i32_25 = arith.constant 0 : i32
    %33 = vector.broadcast %c0_i32_25 : i32 to vector<1x64xi32>
    %34 = arith.cmpi eq, %32, %33 : vector<1x64xi32>
    %35 = vector.extract_strided_slice %15 {offsets = [0, 0], sizes = [4, 1], strides = [1, 1]} : vector<4x64xf32> to vector<4x1xf32>
    %36 = vector.extract_strided_slice %15 {offsets = [0, 0], sizes = [4, 63], strides = [1, 1]} : vector<4x64xf32> to vector<4x63xf32>
    %37 = tpu.concatenate %35, %36 in 1 : vector<4x1xf32>, vector<4x63xf32> -> vector<4x64xf32>
    %38 = vector.shape_cast %34 : vector<1x64xi1> to vector<1x64xi1>
    %39 = vector.broadcast %38 : vector<1x64xi1> to vector<4x64xi1>
    %40 = arith.select %39, %15, %37 : vector<4x64xi1>, vector<4x64xf32>
    %41 = vector.extract_strided_slice %3 {offsets = [0, 0], sizes = [4, 1], strides = [1, 1]} : vector<4x64xf32> to vector<4x1xf32>
    %42 = vector.extract_strided_slice %3 {offsets = [0, 0], sizes = [4, 63], strides = [1, 1]} : vector<4x64xf32> to vector<4x63xf32>
    %43 = tpu.concatenate %41, %42 in 1 : vector<4x1xf32>, vector<4x63xf32> -> vector<4x64xf32>
    %44 = vector.shape_cast %34 : vector<1x64xi1> to vector<1x64xi1>
    %45 = vector.broadcast %44 : vector<1x64xi1> to vector<4x64xi1>
    %46 = arith.select %45, %3, %43 : vector<4x64xi1>, vector<4x64xf32>
    %47 = vector.extract_strided_slice %7 {offsets = [0, 0], sizes = [4, 1], strides = [1, 1]} : vector<4x64xf32> to vector<4x1xf32>
    %48 = vector.extract_strided_slice %7 {offsets = [0, 0], sizes = [4, 63], strides = [1, 1]} : vector<4x64xf32> to vector<4x63xf32>
    %49 = tpu.concatenate %47, %48 in 1 : vector<4x1xf32>, vector<4x63xf32> -> vector<4x64xf32>
    %50 = vector.shape_cast %34 : vector<1x64xi1> to vector<1x64xi1>
    %51 = vector.broadcast %50 : vector<1x64xi1> to vector<4x64xi1>
    %52 = arith.select %51, %7, %49 : vector<4x64xi1>, vector<4x64xf32>
    %cst = arith.constant 0.000000e+00 : f32
    %53 = vector.broadcast %cst : f32 to vector<8x64xf32>
    %c0_26 = arith.constant 0 : index
    %c0_27 = arith.constant 0 : index
    %c0_28 = arith.constant 0 : index
    %54 = vector.load %arg4[%c0_26, %c0_27, %c0_28] : memref<9x8x4xf32, #tpu.memory_space<vmem>>, vector<1x8x4xf32>
    %55 = vector.shape_cast %54 : vector<1x8x4xf32> to vector<8x4xf32>
    %cst_29 = arith.constant dense<0.000000e+00> : vector<8x64xf32>
    %56 = tpu.matmul %55, %40, %cst_29 {dimension_numbers = #tpu.dot_dimension_numbers<[1], [0], [0], [1], [0, 0, 1, 1], [], []>} : vector<8x4xf32>, vector<4x64xf32>, vector<8x64xf32> -> vector<8x64xf32>
    %57 = arith.addf %53, %56 : vector<8x64xf32>
    %c1_30 = arith.constant 1 : index
    %c0_31 = arith.constant 0 : index
    %c0_32 = arith.constant 0 : index
    %58 = vector.load %arg4[%c1_30, %c0_31, %c0_32] : memref<9x8x4xf32, #tpu.memory_space<vmem>>, vector<1x8x4xf32>
    %59 = vector.shape_cast %58 : vector<1x8x4xf32> to vector<8x4xf32>
    %cst_33 = arith.constant dense<0.000000e+00> : vector<8x64xf32>
    %60 = tpu.matmul %59, %13, %cst_33 {dimension_numbers = #tpu.dot_dimension_numbers<[1], [0], [0], [1], [0, 0, 1, 1], [], []>} : vector<8x4xf32>, vector<4x64xf32>, vector<8x64xf32> -> vector<8x64xf32>
    %61 = arith.addf %57, %60 : vector<8x64xf32>
    %c2_34 = arith.constant 2 : index
    %c0_35 = arith.constant 0 : index
    %c0_36 = arith.constant 0 : index
    %62 = vector.load %arg4[%c2_34, %c0_35, %c0_36] : memref<9x8x4xf32, #tpu.memory_space<vmem>>, vector<1x8x4xf32>
    %63 = vector.shape_cast %62 : vector<1x8x4xf32> to vector<8x4xf32>
    %cst_37 = arith.constant dense<0.000000e+00> : vector<8x64xf32>
    %64 = tpu.matmul %63, %15, %cst_37 {dimension_numbers = #tpu.dot_dimension_numbers<[1], [0], [0], [1], [0, 0, 1, 1], [], []>} : vector<8x4xf32>, vector<4x64xf32>, vector<8x64xf32> -> vector<8x64xf32>
    %65 = arith.addf %61, %64 : vector<8x64xf32>
    %c3_38 = arith.constant 3 : index
    %c0_39 = arith.constant 0 : index
    %c0_40 = arith.constant 0 : index
    %66 = vector.load %arg4[%c3_38, %c0_39, %c0_40] : memref<9x8x4xf32, #tpu.memory_space<vmem>>, vector<1x8x4xf32>
    %67 = vector.shape_cast %66 : vector<1x8x4xf32> to vector<8x4xf32>
    %cst_41 = arith.constant dense<0.000000e+00> : vector<8x64xf32>
    %68 = tpu.matmul %67, %46, %cst_41 {dimension_numbers = #tpu.dot_dimension_numbers<[1], [0], [0], [1], [0, 0, 1, 1], [], []>} : vector<8x4xf32>, vector<4x64xf32>, vector<8x64xf32> -> vector<8x64xf32>
    %69 = arith.addf %65, %68 : vector<8x64xf32>
    %c4 = arith.constant 4 : index
    %c0_42 = arith.constant 0 : index
    %c0_43 = arith.constant 0 : index
    %70 = vector.load %arg4[%c4, %c0_42, %c0_43] : memref<9x8x4xf32, #tpu.memory_space<vmem>>, vector<1x8x4xf32>
    %71 = vector.shape_cast %70 : vector<1x8x4xf32> to vector<8x4xf32>
    %cst_44 = arith.constant dense<0.000000e+00> : vector<8x64xf32>
    %72 = tpu.matmul %71, %1, %cst_44 {dimension_numbers = #tpu.dot_dimension_numbers<[1], [0], [0], [1], [0, 0, 1, 1], [], []>} : vector<8x4xf32>, vector<4x64xf32>, vector<8x64xf32> -> vector<8x64xf32>
    %73 = arith.addf %69, %72 : vector<8x64xf32>
    %c5 = arith.constant 5 : index
    %c0_45 = arith.constant 0 : index
    %c0_46 = arith.constant 0 : index
    %74 = vector.load %arg4[%c5, %c0_45, %c0_46] : memref<9x8x4xf32, #tpu.memory_space<vmem>>, vector<1x8x4xf32>
    %75 = vector.shape_cast %74 : vector<1x8x4xf32> to vector<8x4xf32>
    %cst_47 = arith.constant dense<0.000000e+00> : vector<8x64xf32>
    %76 = tpu.matmul %75, %3, %cst_47 {dimension_numbers = #tpu.dot_dimension_numbers<[1], [0], [0], [1], [0, 0, 1, 1], [], []>} : vector<8x4xf32>, vector<4x64xf32>, vector<8x64xf32> -> vector<8x64xf32>
    %77 = arith.addf %73, %76 : vector<8x64xf32>
    %c6 = arith.constant 6 : index
    %c0_48 = arith.constant 0 : index
    %c0_49 = arith.constant 0 : index
    %78 = vector.load %arg4[%c6, %c0_48, %c0_49] : memref<9x8x4xf32, #tpu.memory_space<vmem>>, vector<1x8x4xf32>
    %79 = vector.shape_cast %78 : vector<1x8x4xf32> to vector<8x4xf32>
    %cst_50 = arith.constant dense<0.000000e+00> : vector<8x64xf32>
    %80 = tpu.matmul %79, %52, %cst_50 {dimension_numbers = #tpu.dot_dimension_numbers<[1], [0], [0], [1], [0, 0, 1, 1], [], []>} : vector<8x4xf32>, vector<4x64xf32>, vector<8x64xf32> -> vector<8x64xf32>
    %81 = arith.addf %77, %80 : vector<8x64xf32>
    %c7 = arith.constant 7 : index
    %c0_51 = arith.constant 0 : index
    %c0_52 = arith.constant 0 : index
    %82 = vector.load %arg4[%c7, %c0_51, %c0_52] : memref<9x8x4xf32, #tpu.memory_space<vmem>>, vector<1x8x4xf32>
    %83 = vector.shape_cast %82 : vector<1x8x4xf32> to vector<8x4xf32>
    %cst_53 = arith.constant dense<0.000000e+00> : vector<8x64xf32>
    %84 = tpu.matmul %83, %5, %cst_53 {dimension_numbers = #tpu.dot_dimension_numbers<[1], [0], [0], [1], [0, 0, 1, 1], [], []>} : vector<8x4xf32>, vector<4x64xf32>, vector<8x64xf32> -> vector<8x64xf32>
    %85 = arith.addf %81, %84 : vector<8x64xf32>
    %c8 = arith.constant 8 : index
    %c0_54 = arith.constant 0 : index
    %c0_55 = arith.constant 0 : index
    %86 = vector.load %arg4[%c8, %c0_54, %c0_55] : memref<9x8x4xf32, #tpu.memory_space<vmem>>, vector<1x8x4xf32>
    %87 = vector.shape_cast %86 : vector<1x8x4xf32> to vector<8x4xf32>
    %cst_56 = arith.constant dense<0.000000e+00> : vector<8x64xf32>
    %88 = tpu.matmul %87, %7, %cst_56 {dimension_numbers = #tpu.dot_dimension_numbers<[1], [0], [0], [1], [0, 0, 1, 1], [], []>} : vector<8x4xf32>, vector<4x64xf32>, vector<8x64xf32> -> vector<8x64xf32>
    %89 = arith.addf %85, %88 : vector<8x64xf32>
    %c0_57 = arith.constant 0 : index
    %c0_58 = arith.constant 0 : index
    %90 = vector.load %arg5[%c0_57, %c0_58] : memref<8x1xf32, #tpu.memory_space<vmem>>, vector<8x1xf32>
    %91 = vector.broadcast %90 : vector<8x1xf32> to vector<8x64xf32>
    %92 = arith.addf %89, %91 : vector<8x64xf32>
    %c0_59 = arith.constant 0 : index
    %c0_60 = arith.constant 0 : index
    %c0_61 = arith.constant 0 : index
    %93 = vector.load %arg7[%c0_59, %c0_60, %c0_61] : memref<1x8x64xf32, #tpu.memory_space<vmem>>, vector<1x8x64xf32>
    %94 = vector.shape_cast %93 : vector<1x8x64xf32> to vector<8x64xf32>
    %95 = arith.addf %92, %94 : vector<8x64xf32>
    %cst_62 = arith.constant 0.000000e+00 : f32
    %96 = vector.broadcast %cst_62 : f32 to vector<8x64xf32>
    %97 = arith.cmpf ogt, %95, %96 : vector<8x64xf32>
    %c0_63 = arith.constant 0 : index
    %c0_64 = arith.constant 0 : index
    %98 = vector.load %arg6[%c0_63, %c0_64] : memref<8x1xf32, #tpu.memory_space<vmem>>, vector<8x1xf32>
    %99 = vector.broadcast %98 : vector<8x1xf32> to vector<8x64xf32>
    %100 = arith.mulf %99, %95 : vector<8x64xf32>
    %101 = arith.select %97, %95, %100 : vector<8x64xi1>, vector<8x64xf32>
    %c0_65 = arith.constant 0 : index
    %c0_66 = arith.constant 0 : index
    %c0_67 = arith.constant 0 : index
    %102 = vector.load %arg8[%c0_65, %c0_66, %c0_67] : memref<1x8x64xf32, #tpu.memory_space<vmem>>, vector<1x8x64xf32>
    %103 = vector.shape_cast %102 : vector<1x8x64xf32> to vector<8x64xf32>
    %104 = vector.shape_cast %101 : vector<8x64xf32> to vector<1x8x64xf32>
    tpu.vector_store %arg8[%c0_65, %c0_66, %c0_67], %104 {strides = array<i32>} : memref<1x8x64xf32, #tpu.memory_space<vmem>>, vector<1x8x64xf32>,
    return
  }
  func.func @transform_0(%arg0: i32, %arg1: i32) -> (i32, i32, i32, i32) {
    %c0_i32 = arith.constant 0 : i32
    %c0_i32_0 = arith.constant 0 : i32
    %c0_i32_1 = arith.constant 0 : i32
    return %arg0, %c0_i32, %c0_i32_0, %arg1 : i32, i32, i32, i32
  }
  func.func @transform_1(%arg0: i32, %arg1: i32) -> (i32, i32, i32, i32, i32) {
    %c0_i32 = arith.constant 0 : i32
    %c0_i32_0 = arith.constant 0 : i32
    %c0_i32_1 = arith.constant 0 : i32
    %c0_i32_2 = arith.constant 0 : i32
    return %arg0, %arg1, %c0_i32, %c0_i32_0, %c0_i32_1 : i32, i32, i32, i32, i32
  }
  func.func @transform_2(%arg0: i32, %arg1: i32) -> (i32, i32, i32) {
    %c0_i32 = arith.constant 0 : i32
    %c0_i32_0 = arith.constant 0 : i32
    %c0_i32_1 = arith.constant 0 : i32
    %c0_i32_2 = arith.constant 0 : i32
    return %c0_i32, %c0_i32_0, %c0_i32_1 : i32, i32, i32
  }
  func.func @transform_3(%arg0: i32, %arg1: i32) -> (i32, i32) {
    %c0_i32 = arith.constant 0 : i32
    %c0_i32_0 = arith.constant 0 : i32
    %c0_i32_1 = arith.constant 0 : i32
    return %c0_i32, %c0_i32_0 : i32, i32
  }
  func.func @transform_4(%arg0: i32, %arg1: i32) -> (i32, i32) {
    %c0_i32 = arith.constant 0 : i32
    %c0_i32_0 = arith.constant 0 : i32
    %c0_i32_1 = arith.constant 0 : i32
    return %c0_i32, %c0_i32_0 : i32, i32
  }
  func.func @transform_5(%arg0: i32, %arg1: i32) -> (i32, i32, i32) {
    %c0_i32 = arith.constant 0 : i32
    %c0_i32_0 = arith.constant 0 : i32
    return %arg0, %c0_i32, %arg1 : i32, i32, i32
  }
  func.func @transform_6(%arg0: i32, %arg1: i32) -> (i32, i32, i32) {
    %c0_i32 = arith.constant 0 : i32
    %c0_i32_0 = arith.constant 0 : i32
    return %arg0, %c0_i32, %arg1 : i32, i32, i32
  }
}

</mosaic_0001>

<bundles_post_ra>
// kernel: tpu_custom_call.1
= control target key start
LH: loop header
LB: loop body
LE: loop exit
PB: predicated region body
PF: predicated region fallthrough
CT: control target
= control target key end

     0   :  { %11 = vsyncpa [#allocation3], 0  ;;  %s1764_s0 = inlined_call_operand.vmem [shape: f32[2,4,4,64], index: 0, kind: input, shape index: {}]   ;;  %s1765_s1 = inlined_call_operand.vmem [shape: f32[2,1,2,4,8], index: 1, kind: input, shape index: {}]   ;;  %s1766_s2 = inlined_call_operand.vmem [shape: f32[9,8,4], index: 2, kind: input, shape index: {}]   ;;  %s1767_s3 = inlined_call_operand.vmem [shape: f32[8,1], index: 3, kind: input, shape index: {}]   ;;  %s1768_s4 = inlined_call_operand.vmem [shape: f32[8,1], index: 4, kind: input, shape index: {}]   ;;  %s1769_s5 = inlined_call_operand.vmem [shape: f32[2,8,64], index: 5, kind: input, shape index: {}]   ;;  %s1770_s6 = inlined_call_operand.hbm [shape: f32[2,8,64], index: 6, kind: output, shape index: {}]  }
   0x1   :  { %13 = vsyncpa [#allocation3 + $0x1], 0  ;;  %s1537_s21 = smov 0   ;;  %s1539_s22 = smov 0  }
   0x2   :  { %s1541_s23 = smov 0   ;;  %s1543_s24 = smov 0  }
   0x3   :  { %s1545_s25 = smov 0   ;;  %s1547_s26 = smov 0  }
   0x4 LB: > { %s1244_s27 = sadd.s32 4294967295, %s1494_s26   ;;  %s1245_s28 = sadd.s32 4294967294, %s1494_s26   ;;  %s1494_s26 = sphi %s1547_s26, %s19_s26   ;;  %s1490_s25 = sphi %s1545_s25, %s1779_s25   ;;  %s1486_s24 = sphi %s1543_s24, %s1778_s24   ;;  %s1482_s23 = sphi %s1541_s23, %s1777_s23   ;;  %s1478_s22 = sphi %s1539_s22, %s1776_s22   ;;  %s1474_s21 = sphi %s1537_s21, %s1775_s21  }
   0x5   : > { %s31_s29 = sadd.s32 1, %s1490_s25  ;;  %s187_s30 = sadd.s32 1, %s1482_s23 }
   0x6   : > { %p33_p0 = scmp.ge.s32.totalorder %s31_s29, 2  ;;  %p197_p1 = scmp.ne.s32.totalorder %s1482_s23, %s1478_s22 }
   0x7   : > { %p198_p2 = scmp.eq.s32.totalorder %s1244_s27, 1  ;;  %p203_p3 = scmp.ne.s32.totalorder %s1478_s22, %s1474_s21 }
   0x8   : > { %s1781_s29 = smov (%p33_p0, %s31_s29), 0  ;;  %p204_p5 = scmp.eq.s32.totalorder %s1245_s28, 1 }
   0x9   : > { %p1577_p4 = por %p198_p2, %p197_p1  ;;  %s182_s8 = ssub.s32 %s1490_s25, %s1781_s29 }
   0xa   : > { %p1248_p6 = scmp.ge.s32.totalorder %s1494_s26, 1  ;;  %p185_p7 = scmp.eq.s32.totalorder %s182_s8, 0 }
   0xb   : > { %p1584_p8 = por %p204_p5, %p203_p3  ;;  %p264_p9 = scmp.lt.s32.totalorder %s1494_s26, 3 }
   0xc   : > { %s1590_s10 = scalar_select %p185_p7, %s1482_s23, %s187_s30  }
   0xd   : > { %p265_p10 = pnand %p1248_p6, %p264_p9 }
   0xe   : > { %p313_p11 = scmp.lt.s32.totalorder (!%p265_p10), %s1486_s24, 1  ;;  %v1496_v0 = vmov (!%p265_p10), 0.0   ;;  %vm1497_vm0 = vmmov (!%p265_p10), 0   ;;  %s1498_s16 = smov (!%p265_p10), 8   ;;  %vm351_vm1 = vcmask (!%p265_p10), 64512   ;;  %v358_v5 = vlaneseq (!%p265_p10)  ;;  %v1259_v10 = vld [vmem:[%s1766_s2 + $0x8] sm:$0xff] (!%p265_p10) }
   0xf   : > { %268 = sbr.rel (%p265_p10) target bundleno = 510 (0x1fe), region = 44  ;;  %1309 = vmatprep.subr.mxu0 (!%p265_p10), %v1496_v0  ;;  %1311 = vmatprep.mubr.msk.f32.mxu0 (!%p265_p10), %vm1497_vm0, %v1496_v0  ;;  %s1499_s17 = smov (!%p265_p10), 1   ;;  %vm400_vm2 = vcmask (!%p265_p10), 1043456   ;;  %vm396_vm3 = vcmask (!%p265_p10), 31744   ;;  %v1500_v13 = vmov (!%p265_p10), 0   ;;  %v1109_v14 = vld [vmem:[%s1768_s4] sm:$0xff] (!%p265_p10) }
  0x10   : > { %1314 = vmatprep.subr.mxu1 (!%p265_p10), %v1496_v0  ;;  %1316 = vmatprep.mubr.msk.f32.mxu1 (!%p265_p10), %vm1497_vm0, %v1496_v0  ;;  %v359_v11 = vand.u32 (!%p265_p10), 127, %v358_v5  ;;  %v1099_v15 = vld [vmem:[%s1767_s3] sm:$0xff] (!%p265_p10)  ;;  %v1264_v17 = vld [vmem:[%s1766_s2 + $0x10] sm:$0xff] (!%p265_p10)  ;;  %vm377_vm4 = vcmask (!%p265_p10), 7168   ;;  %v1267_v32 = vld [vmem:[%s1766_s2 + $0x18] sm:$0xff] (!%p265_p10)  ;;  %vm1117_vm7 = vcmask (!%p265_p10), 523264  }
  0x11   : > { %1414 = vset.pattern.permute.xlu1 (!%p265_p10), %v1500_v13  ;;  %1415 = vset.pattern.permute.xlu0 (!%p265_p10), %v1500_v13  ;;  %v1270_v22 = vld [vmem:[%s1766_s2 + $0x20] sm:$0xff] (!%p265_p10)  ;;  %v1276_v24 = vld [vmem:[%s1766_s2 + $0x30] sm:$0xff] (!%p265_p10)  ;;  %v1273_v34 = vld [vmem:[%s1766_s2 + $0x28] sm:$0xff] (!%p265_p10) }
  0x12   : > { %v364_v16 = vand.u32 (!%p265_p10), 7, %v359_v11  ;;  %v1282_v25 = vld [vmem:[%s1766_s2 + $0x40] sm:$0xff] (!%p265_p10)  ;;  %v1279_v35 = vld [vmem:[%s1766_s2 + $0x38] sm:$0xff] (!%p265_p10) }
  0x13   : > { %v393_v28 = vld [vmem:[%s1766_s2] sm:$0xff] (!%p265_p10) }
  0x14   : > { %vm1642_vm5 = vcmp.eq.s32.totalorder (!%p265_p10), %v364_v16, 0 }
  0x16   : > { %s1597_s11 = scalar_select %p313_p11, %s1486_s24, 1 }
  0x18   : > { %s1289_s12 = sshll.u32 %s1597_s11, 4  ;;  %s1290_s18 = sshll.u32 %s1597_s11, 3 }
  0x19   : > { %s1606_s15 = scalar_lea.vmem %s1764_s0, %s1289_s12  ;;  %s329_s27 = scalar_lea.vmem %s1765_s1, %s1290_s18 }
  0x1a   : > { %v1257_v1 = vld [vmem:[%s1606_s15 + $0xc] sm:$0xf]  ;;  %v1610_v2 = vld [vmem:[%s1606_s15 + $0x8] sm:$0xf]  ;;  %v1258_v3 = vld [vmem:[%s329_s27 + $0x4] sm:$0xf]  ;;  %s336_s30 = scalar_lea.vmem %s1769_s5, %s1290_s18 }
  0x1b   : > { %354 = vrot.lane.b32.xlu0 %v1257_v1, %s1498_s16  ;;  %v344_v7 = vld [vmem:[%s329_s27] sm:$0xf]  ;;  %v1255_v8 = vld [vmem:[%s1606_s15 + $0x4] sm:$0xf]  ;;  %s1286_s12 = sshll.u32 %s1486_s24, 7  ;;  %s1501_s24 = smov [#allocation2]  }
  0x1c   : > { %v337_v19 = vld [vmem:[%s1606_s15] sm:$0xf]  ;;  %s310_s15 = sand.u32 1, %s1478_s22   ;;  %s1420_s20 = sshll.u32 %s1501_s24, 4  ;;  %s1421_s20 = int_to_ptr.vmem [resolvable:$false] %s1420_s20 }
  0x1d   : > { %s1249_s8 = sshll.u32 %s310_s15, 3  ;;  %v1106_v63 = vld [vmem:[%s336_s30] sm:$0xff]  ;;  %s1120_s18 = scalar_lea.sflag [#allocation3], %s310_s15 }
  0x1e   : > { %s312_s13 = scalar_lea.vmem [#allocation2], %s1249_s8  ;;  %s1422_s27 = scalar_lea.vmem %s1421_s20, 256 }
  0x1f   : > { %348 = vrot.lane.b32.xlu0 %v1610_v2, %s1498_s16  ;;  %s1134_s14 = sshll.u32 %s312_s13, 4  ;;  %s1719_s14 = int_to_ptr.vmem [resolvable:$true] %s1134_s14 }
  0x20   : > { %s1416_s19 = scalar_lea.vmem %s1719_s14, 128  ;;  %p1423_p1 = scmp.lt.s32.totalorder %s1719_s14, %s1421_s20 }
  0x21   : > { %p1417_p12 = scmp.ne.s32.totalorder %s1719_s14, %s1416_s19  ;;  %p1424_p2 = scmp.lt.s32.totalorder %s1422_s27, %s1416_s19 }
  0x23   : > { %388 = vrot.lane.b32.xlu0 %v1257_v1, %s1499_s17  ;;  %p1418_p13 = pnand %p1417_p12, %p1577_p4  ;;  %p1425_p3 = por %p1424_p2, %p1423_p1 }
  0x25   : > { %p1419_p0 = pneg %p1418_p13 }
  0x27   : > { %1112 = vperm.xlu0 %1415, %v1109_v14   ;;  %p1426_p5 = pnand %p1425_p3, %p1419_p0 }
  0x8d   : > { %v355_v4 = vpop.permute.xlu0 %354 }
  0x8e   : > { %v357_v6 = vsel %vm351_vm1, %v1258_v3, %v355_v4 }
  0x8f   : > { %374 = vrot.lane.b32.xlu1 %v357_v6, %s1499_s17 }
  0x91   : > { %v349_v9 = vpop.permute.xlu0 %348 }
  0x92   : > { %v352_v12 = vsel %vm351_vm1, %v344_v7, %v349_v9 }
  0x93   : > { %1310 = vmatpush3.msk.msra.mxu0 %vm400_vm2, %v352_v12  ;;  %383 = vrot.lane.b32.xlu1 %v1255_v8, %s1499_s17  ;;  %s1717_s17 = scalar_lea.hbm %s1770_s6, %s1286_s12 }
  0x94   : > { %1319 = vmatprep.subr.mxu0 %v1496_v0  ;;  %1312 = vmatmul.mubr.msk.f32.vlgmr.msra.gmra.mrb[0].mxu0 %vm396_vm3, %v1259_v10 }
  0x95   : > { %1320 = vmatpush3.msk.msra.mxu0 %vm400_vm2, %v357_v6  ;;  %1321 = vmatprep.mubr.msk.f32.mxu0 %vm1497_vm0, %v1496_v0  ;;  %v389_v18 = vpop.permute.xlu0 %388 }
  0x96   : > { %1329 = vmatprep.subr.mxu0 %v1496_v0  ;;  %v391_v20 = vsel %vm377_vm4, %v1257_v1, %v389_v18 }
  0x97   : > { %1102 = vperm.xlu1 %1414, %v1099_v15   ;;  %v392_v23 = vsel %vm1642_vm5, %v1257_v1, %v391_v20 }
  0x98   : > { %1322 = vmatmul.mubr.msk.f32.vlgmr.msra.gmra.mrb[2].mxu0 %vm396_vm3, %v1264_v17 }
  0x99   : > { %1330 = vmatpush3.msk.msra.mxu0 %vm400_vm2, %v337_v19  ;;  %1331 = vmatprep.mubr.msk.f32.mxu0 %vm1497_vm0, %v1496_v0 }
  0x9a   : > { %1339 = vmatprep.subr.mxu0 %v1496_v0 }
  0x9c   : > { %1332 = vmatmul.mubr.msk.f32.vlgmr.msra.gmra.mrb[4].mxu0 %vm396_vm3, %v1270_v22 }
  0x9d   : > { %1340 = vmatpush3.msk.msra.mxu0 %vm400_vm2, %v392_v23  ;;  %1341 = vmatprep.mubr.msk.f32.mxu0 %vm1497_vm0, %v1496_v0 }
  0x9e   : > { %1349 = vmatprep.subr.mxu0 %v1496_v0 }
  0xa0   : > { %1342 = vmatmul.mubr.msk.f32.vlgmr.msra.gmra.mrb[6].mxu0 %vm396_vm3, %v1276_v24 }
  0xa1   : > { %1350 = vmatpush3.msk.msra.mxu0 %vm400_vm2, %v1257_v1  ;;  %1351 = vmatprep.mubr.msk.f32.mxu0 %vm1497_vm0, %v1496_v0 }
  0xa4   : > { %1352 = vmatmul.mubr.msk.f32.vlgmr.msra.gmra.mrb[8].mxu0 %vm396_vm3, %v1282_v25 }
  0xa6   : > { %v1113_v1 = vpop.permute.xlu0 %1112 }
 0x101   : > { %v375_v26 = vpop.permute.xlu1 %374 }
 0x102   : > { %v378_v27 = vsel %vm377_vm4, %v357_v6, %v375_v26 }
 0x103   : > { %v381_v29 = vsel %vm1642_vm5, %v357_v6, %v378_v27 }
 0x104   : > { %1315 = vmatpush3.msk.msra.mxu1 %vm400_vm2, %v381_v29 }
 0x105   : > { %1317 = vmatmul.mubr.msk.f32.vlgmr.msra.gmra.mrb[0].mxu1 %vm396_vm3, %v393_v28  ;;  %v384_v30 = vpop.permute.xlu1 %383  ;;  %1324 = vmatprep.subr.mxu1 %v1496_v0 }
 0x106   : > { %v386_v31 = vsel %vm377_vm4, %v1255_v8, %v384_v30  ;;  %1326 = vmatprep.mubr.msk.f32.mxu1 %vm1497_vm0, %v1496_v0 }
 0x107   : > { %v387_v33 = vsel %vm1642_vm5, %v1255_v8, %v386_v31 }
 0x108   : > { %1325 = vmatpush3.msk.msra.mxu1 %vm400_vm2, %v387_v33 }
 0x109   : > { %1327 = vmatmul.mubr.msk.f32.vlgmr.msra.gmra.mrb[2].mxu1 %vm396_vm3, %v1267_v32  ;;  %1334 = vmatprep.subr.mxu1 %v1496_v0 }
 0x10a   : > { %1335 = vmatpush3.msk.msra.mxu1 %vm400_vm2, %v1255_v8  ;;  %1336 = vmatprep.mubr.msk.f32.mxu1 %vm1497_vm0, %v1496_v0 }
 0x10b   : > { %1344 = vmatprep.subr.mxu1 %v1496_v0 }
 0x10d   : > { %1337 = vmatmul.mubr.msk.f32.vlgmr.msra.gmra.mrb[4].mxu1 %vm396_vm3, %v1273_v34 }
 0x10e   : > { %1345 = vmatpush3.msk.msra.mxu1 %vm400_vm2, %v1610_v2  ;;  %1346 = vmatprep.mubr.msk.f32.mxu1 %vm1497_vm0, %v1496_v0 }
 0x111   : > { %1347 = vmatmul.mubr.msk.f32.vlgmr.msra.gmra.mrb[6].mxu1 %vm396_vm3, %v1279_v35 }
 0x116   : > { %v1103_v61 = vpop.permute.xlu1 %1102 }
 0x167   : > { %v470_v36 = vpop.f32.mrb[0].mxu0 }
 0x168   : > { %v1313_v37 = vpop.f32.mrb[1].mxu0 }
 0x16b   : > { %v623_v38 = vpop.f32.mrb[2].mxu0 }
 0x16c   : > { %v1323_v39 = vpop.f32.mrb[3].mxu0 }
 0x16f   : > { %v781_v40 = vpop.f32.mrb[4].mxu0 }
 0x170   : > { %v1333_v41 = vpop.f32.mrb[5].mxu0 }
 0x173   : > { %v938_v42 = vpop.f32.mrb[6].mxu0 }
 0x174   : > { %v1343_v43 = vpop.f32.mrb[7].mxu0 }
 0x177   : > { %v1094_v44 = vpop.f32.mrb[8].mxu0 }
 0x178   : > { %v1353_v45 = vpop.f32.mrb[9].mxu0 }
 0x1d8   : > { %v546_v46 = vpop.f32.mrb[0].mxu1 }
 0x1d9   : > { %v547_v47 = vadd.f32 %v546_v46, %v470_v36  ;;  %v1318_v48 = vpop.f32.mrb[1].mxu1 }
 0x1db   : > { %v627_v49 = vadd.f32 %v623_v38, %v547_v47 }
 0x1dc   : > { %v702_v50 = vpop.f32.mrb[2].mxu1 }
 0x1dd   : > { %v706_v51 = vadd.f32 %v702_v50, %v627_v49  ;;  %v1328_v52 = vpop.f32.mrb[3].mxu1 }
 0x1df   : > { %v785_v53 = vadd.f32 %v781_v40, %v706_v51 }
 0x1e0   : > { %v859_v54 = vpop.f32.mrb[4].mxu1 }
 0x1e1   : > { %v863_v55 = vadd.f32 %v859_v54, %v785_v53  ;;  %v1338_v56 = vpop.f32.mrb[5].mxu1 }
 0x1e3   : > { %v942_v57 = vadd.f32 %v938_v42, %v863_v55 }
 0x1e4   : > { %v1016_v58 = vpop.f32.mrb[6].mxu1 }
 0x1e5   : > { %v1020_v59 = vadd.f32 %v1016_v58, %v942_v57  ;;  %v1348_v60 = vpop.f32.mrb[7].mxu1 }
 0x1e7   : > { %v1098_v62 = vadd.f32 %v1094_v44, %v1020_v59 }
 0x1e9   : > { %v1105_v0 = vadd.f32 %v1103_v61, %v1098_v62 }
 0x1eb   : > { %v1107_v2 = vadd.f32 %v1106_v63, %v1105_v0 }
 0x1ed   : > { %vm1108_vm6 = vcmp.gt.f32.partialorder %v1107_v2, 0.0  ;;  %v1115_v3 = vmul.f32 %v1113_v1, %v1107_v2 }
 0x1ef   : > { %v1116_v4 = vsel %vm1108_vm6, %v1107_v2, %v1115_v3 }
 0x1f0   : > { %1118 = vst.msk [vmem:[%s312_s13] sm:$0xff] %vm1117_vm7, %v1116_v4 }
 0x1f1   : > { %1429 = shalt.err (!%p1426_p5)
}
 0x1f2   : > { %s1430_s15 = scalar_lea.hbm %s1717_s17, 128  ;;  %s1434_s8 = scalar_lea.hbm %s1770_s6, 256 }
 0x1f3   : > { %p1431_p6 = scmp.ne.s32.totalorder %s1717_s17, %s1430_s15  ;;  %p1435_p10 = scmp.lt.u32.totalorder %s1717_s17, %s1770_s6 }
 0x1f4   : > { %p1436_p11 = scmp.lt.u32.totalorder %s1434_s8, %s1430_s15  ;;  %p1438_p13 = scmp.lt.u32.totalorder %s1430_s15, %s1717_s17 }
 0x1f5   : > { %p1432_p7 = pnand %p1431_p6, %p1577_p4 }
 0x1f6   : > { %p1437_p12 = por %p1436_p11, %p1435_p10 }
 0x1f7   : > { %p1433_p9 = pneg %p1432_p7 }
 0x1f8   : > { %p1439_p0 = por %p1438_p13, %p1437_p12 }
 0x1fa   : > { %p1440_p1 = pnand %p1439_p0, %p1433_p9 }
 0x1fc   : > { %1443 = shalt.err (!%p1440_p1)
}
 0x1fd   : > { %1354 = dma.vmem_to_hbm [thread:$0]  (%p1577_p4), %s1719_s14, 128, %s1717_s17, %s1120_s18  }
 0x1fe PF: > { %p1360_p2 = scmp.ge.s32.totalorder %s1494_s26, 2  ;;  %s1146_s16 = sand.u32 1, %s1474_s21  }
 0x1ff   : > { %s1147_s11 = scalar_lea.sflag [#allocation3], %s1146_s16 }
 0x200   : > { %p1357_p3 = pnand %p1360_p2, %p1584_p8 }
 0x202   : > { %1469 = dma.done.wait (!%p1357_p3), %s1147_s11, 128  }
 0x203   : > { %1471 = vsyncadd (!%p1357_p3), %s1147_s11, 4294967168  ;;  %s19_s26 = sadd.s32 1, %s1494_s26   ;;  %s1775_s21 = smov %s1478_s22 }
 0x204   : > { %p16_p5 = scmp.ge.s32.totalorder %s19_s26, 4   ;;  %s1776_s22 = smov %s1482_s23 }
 0x205   : > { %s1777_s23 = smov %s1590_s10  ;;  %s1778_s24 = smov %s1490_s25 }
 0x206   : > { %s1779_s25 = smov %s1781_s29  ;;  %18 = sbr.rel (!%p16_p5) target bundleno = 4 (0x4), region = 97 }
 0x20d   :  { %1152 = vsyncpa [#allocation3], 1 }
 0x20e   :  { %1154 = vsyncpa [#allocation3 + $0x1], 1 }

</bundles_post_ra>
